<compile_context>
chip_gen: v7x
topology: tpu7x:2x2x1
jax: 0.10.0
libtpu: 0.0.40
codegen_flags: <defaults>
</compile_context>

<pallas_src>
import functools

import jax
import jax.numpy as jnp
from jax.experimental import pallas as pl
from jax.experimental.pallas import tpu as pltpu

LN_EPS = 1e-5    # PyTorch nn.LayerNorm default
LANE = 128       # vreg lane width
SUBLANE = 8      # vreg sublane count


def _round_up(x, m):
    return ((x + m - 1) // m) * m


def _masked_layernorm(h, gamma, beta, true_width):
    """LayerNorm over the last dim, ignoring zero-padded lanes >= true_width.

    Padded lanes of `h` are exactly 0 (zero-padded weight columns / biases),
    so the mean only needs the correct divisor; the variance masks the
    (0 - mu)^2 contribution of padded lanes.  gamma/beta are zero-padded, so
    padded lanes come out exactly 0 again (and stay 0 through ReLU).
    """
    padded = h.shape[-1]
    inv_n = 1.0 / float(true_width)
    mu = jnp.sum(h, axis=-1, keepdims=True) * inv_n
    d = h - mu
    sq = d * d
    if padded != true_width:
        mask = (jax.lax.broadcasted_iota(jnp.int32, (1, padded), 1)
                < true_width).astype(h.dtype)
        sq = sq * mask
    var = jnp.sum(sq, axis=-1, keepdims=True) * inv_n
    return d * jax.lax.rsqrt(var + LN_EPS) * gamma + beta


def ppo_critic_kernel(
    x_ref,
    w1_ref, b1_ref, g1_ref, be1_ref,
    w2_ref, b2_ref, g2_ref, be2_ref,
    w3_ref, b3_ref, g3_ref, be3_ref,
    w4_ref, b4_ref,
    out_ref,
    *, true_w, true_h,
):
    x = x_ref[...]

    # l1 -> ln1 -> relu
    h = jnp.dot(x, w1_ref[...], preferred_element_type=jnp.float32) + b1_ref[...]
    h = jnp.maximum(_masked_layernorm(h, g1_ref[...], be1_ref[...], true_w), 0.0)

    # l2 -> ln2 -> relu
    h = jnp.dot(h, w2_ref[...], preferred_element_type=jnp.float32) + b2_ref[...]
    h = jnp.maximum(_masked_layernorm(h, g2_ref[...], be2_ref[...], true_w), 0.0)

    # l3 -> ln3 -> relu
    h = jnp.dot(h, w3_ref[...], preferred_element_type=jnp.float32) + b3_ref[...]
    h = jnp.maximum(_masked_layernorm(h, g3_ref[...], be3_ref[...], true_h), 0.0)

    # l4 value head: w4 (8, Hp) . h(tb, Hp)^T -> (8, tb); row 0 is the real
    # head (rows 1..7 are zero padding for sublane alignment).  The result is
    # already lane-dense (batch on lanes), so the store is an unmasked vst.
    v8 = jax.lax.dot_general(
        w4_ref[...], h,
        dimension_numbers=(((1,), (1,)), ((), ())),
        preferred_element_type=jnp.float32)          # (8, tb)
    v = v8[0:1, :] + b4_ref[...]                      # (1, tb)
    out_ref[...] = v.reshape(out_ref.shape).astype(out_ref.dtype)


def ppo_critic_forward(state, params, *, batch_tile=None):
    """PPO_Critic forward via a fused Pallas TPU kernel.

    state: (B, state_dim) float32
    params: dict of pre-transposed (in, out) weights, (1, out) biases and
            (1, out) LayerNorm gamma/beta; w4 is (half, 1), b4 is (1, 1).
    """
    B, state_dim = state.shape
    net_width = params["w1"].shape[1]
    half_width = params["w3"].shape[1]

    # ---- feature padding: lane-dense (multiples of 128) ---------------------
    Sp = _round_up(state_dim, LANE)
    Wp = _round_up(net_width, LANE)
    Hp = _round_up(half_width, LANE)

    def pad2(a, rows, cols):
        return jnp.pad(a, ((0, rows - a.shape[0]), (0, cols - a.shape[1])))

    w1 = pad2(params["w1"], Sp, Wp); b1 = pad2(params["b1"], 1, Wp)
    g1 = pad2(params["g1"], 1, Wp);  be1 = pad2(params["be1"], 1, Wp)
    w2 = pad2(params["w2"], Wp, Wp); b2 = pad2(params["b2"], 1, Wp)
    g2 = pad2(params["g2"], 1, Wp);  be2 = pad2(params["be2"], 1, Wp)
    w3 = pad2(params["w3"], Wp, Hp); b3 = pad2(params["b3"], 1, Hp)
    g3 = pad2(params["g3"], 1, Hp);  be3 = pad2(params["be3"], 1, Hp)
    # value head stored as a sublane-aligned row block: row 0 = w4^T.
    w4 = pad2(params["w4"].T, SUBLANE, Hp)
    b4 = params["b4"]                                   # (1, 1)

    # ---- batch tiling --------------------------------------------------------
    B_sub = _round_up(B, SUBLANE)
    if batch_tile is None:
        tb = min(B_sub, 256)        # whole batch for small B, 256-row tiles else
    else:
        tb = _round_up(batch_tile, SUBLANE)
    B_pad = _round_up(B, tb)
    num_tiles = B_pad // tb

    x = jnp.pad(state.astype(jnp.float32),
                ((0, B_pad - B), (0, Sp - state_dim)))

    def rep(shape):
        zeros = (0,) * len(shape)
        return pl.BlockSpec(shape, lambda i: zeros)     # replicated operand

    in_specs = [
        pl.BlockSpec((tb, Sp), lambda i: (i, 0)),        # state tile
        rep((Sp, Wp)), rep((1, Wp)), rep((1, Wp)), rep((1, Wp)),   # l1 / ln1
        rep((Wp, Wp)), rep((1, Wp)), rep((1, Wp)), rep((1, Wp)),   # l2 / ln2
        rep((Wp, Hp)), rep((1, Hp)), rep((1, Hp)), rep((1, Hp)),   # l3 / ln3
        rep((SUBLANE, Hp)), rep((1, 1)),                            # l4
    ]
    # Lane-dense output: one (1, 1, tb) row per grid step.
    out_spec = pl.BlockSpec((1, 1, tb), lambda i: (i, 0, 0))

    flops = 2 * B_pad * (Sp * Wp + Wp * Wp + Wp * Hp + SUBLANE * Hp)
    param_elems = (Sp * Wp + Wp * Wp + Wp * Hp + SUBLANE * Hp
                   + 6 * Wp + 3 * Hp + 1)
    cost = pl.CostEstimate(
        flops=flops,
        transcendentals=3 * B_pad,                      # one rsqrt per row per LN
        bytes_accessed=4 * (B_pad * Sp + param_elems + B_pad),
    )

    out = pl.pallas_call(
        functools.partial(ppo_critic_kernel,
                          true_w=net_width, true_h=half_width),
        out_shape=jax.ShapeDtypeStruct((num_tiles, 1, tb), jnp.float32),
        grid_spec=pltpu.PrefetchScalarGridSpec(
            num_scalar_prefetch=0,
            grid=(num_tiles,),
            in_specs=in_specs,
            out_specs=out_spec,
        ),
        compiler_params=pltpu.CompilerParams(
            dimension_semantics=("parallel",),
            vmem_limit_bytes=64 * 1024 * 1024,
        ),
        cost_estimate=cost,
    )(
        x,
        w1, b1, g1, be1,
        w2, b2, g2, be2,
        w3, b3, g3, be3,
        w4, b4,
    )

    return out.reshape(B_pad)[:B].reshape(B, 1)


def init_params(key, state_dim, net_width):
    """Deterministic synthetic parameters (PyTorch-style uniform fan-in init)."""
    half = net_width // 2
    keys = jax.random.split(key, 8)

    def linear(kw, kb, fan_in, fan_out):
        bound = 1.0 / jnp.sqrt(float(fan_in))
        # stored as (in, out) == transpose of torch's (out, in)
        w = jax.random.uniform(kw, (fan_in, fan_out), jnp.float32, -bound, bound)
        b = jax.random.uniform(kb, (1, fan_out), jnp.float32, -bound, bound)
        return w, b

    w1, b1 = linear(keys[0], keys[1], state_dim, net_width)
    w2, b2 = linear(keys[2], keys[3], net_width, net_width)
    w3, b3 = linear(keys[4], keys[5], net_width, half)
    w4, b4 = linear(keys[6], keys[7], half, 1)

    ones = lambda n: jnp.ones((1, n), jnp.float32)
    zeros = lambda n: jnp.zeros((1, n), jnp.float32)

    return {
        "w1": w1, "b1": b1, "g1": ones(net_width), "be1": zeros(net_width),
        "w2": w2, "b2": b2, "g2": ones(net_width), "be2": zeros(net_width),
        "w3": w3, "b3": b3, "g3": ones(half), "be3": zeros(half),
        "w4": w4, "b4": b4,
    }


def reference_forward(state, p):
    """Pure-JAX reference of the PyTorch forward (for sanity checking)."""
    def ln(h, g, b):
        mu = jnp.mean(h, axis=-1, keepdims=True)
        var = jnp.mean((h - mu) ** 2, axis=-1, keepdims=True)
        return (h - mu) / jnp.sqrt(var + LN_EPS) * g + b

    v = jax.nn.relu(ln(state @ p["w1"] + p["b1"], p["g1"], p["be1"]))
    v = jax.nn.relu(ln(v @ p["w2"] + p["b2"], p["g2"], p["be2"]))
    v = jax.nn.relu(ln(v @ p["w3"] + p["b3"], p["g3"], p["be3"]))
    return v @ p["w4"] + p["b4"]


if __name__ == "__main__":
    state_dim = 16
    net_width = 32

    key = jax.random.PRNGKey(0)
    k_params, k_s1, k_s2 = jax.random.split(key, 3)
    params = init_params(k_params, state_dim, net_width)

    # Small batch: single grid step, whole batch in one tile.
    s_small = jax.random.normal(k_s1, (8, state_dim), jnp.float32)
    out_small = jax.block_until_ready(ppo_critic_forward(s_small, params))
    ref_small = reference_forward(s_small, params)
    assert out_small.shape == (8, 1)
    assert jnp.allclose(out_small, ref_small, atol=1e-4, rtol=1e-4), (
        out_small, ref_small)

    # Larger, non-multiple batch: exercises batch padding + 256-row tiles +
    # multi-step parallel grid + lane-dense per-step output rows.
    s_big = jax.random.normal(k_s2, (300, state_dim), jnp.float32)
    out_big = jax.block_until_ready(ppo_critic_forward(s_big, params))
    ref_big = reference_forward(s_big, params)
    assert out_big.shape == (300, 1)
    assert jnp.allclose(out_big, ref_big, atol=1e-4, rtol=1e-4), (
        out_big, ref_big)

    print("KERNEL_OK")
</pallas_src>

<mosaic_0001>
module attributes {stable_mosaic.version = 11 : i64} {
  func.func @ppo_critic_kernel(%arg0: i32, %arg1: memref<8x128xf32, #tpu.memory_space<vmem>>, %arg2: memref<128x128xf32, #tpu.memory_space<vmem>>, %arg3: memref<1x128xf32, #tpu.memory_space<vmem>>, %arg4: memref<1x128xf32, #tpu.memory_space<vmem>>, %arg5: memref<1x128xf32, #tpu.memory_space<vmem>>, %arg6: memref<128x128xf32, #tpu.memory_space<vmem>>, %arg7: memref<1x128xf32, #tpu.memory_space<vmem>>, %arg8: memref<1x128xf32, #tpu.memory_space<vmem>>, %arg9: memref<1x128xf32, #tpu.memory_space<vmem>>, %arg10: memref<128x128xf32, #tpu.memory_space<vmem>>, %arg11: memref<1x128xf32, #tpu.memory_space<vmem>>, %arg12: memref<1x128xf32, #tpu.memory_space<vmem>>, %arg13: memref<1x128xf32, #tpu.memory_space<vmem>>, %arg14: memref<8x128xf32, #tpu.memory_space<vmem>>, %arg15: memref<1x1xf32, #tpu.memory_space<vmem>>, %arg16: memref<1x1x8xf32, #tpu.memory_space<vmem>>) attributes {dimension_semantics = [#tpu.dimension_semantics<parallel>], iteration_bounds = array<i64: 1>, scalar_prefetch = 0 : i64, scratch_operands = 0 : i64, tpu.core_type = #tpu.core_type<tc>, window_params = [{transform_indices = @transform_0, window_bounds = array<i64: 8, 128>}, {pipeline_mode = #tpu.pipeline_mode<synchronous>, transform_indices = @transform_1, window_bounds = array<i64: 128, 128>}, {pipeline_mode = #tpu.pipeline_mode<synchronous>, transform_indices = @transform_2, window_bounds = array<i64: 1, 128>}, {pipeline_mode = #tpu.pipeline_mode<synchronous>, transform_indices = @transform_3, window_bounds = array<i64: 1, 128>}, {pipeline_mode = #tpu.pipeline_mode<synchronous>, transform_indices = @transform_4, window_bounds = array<i64: 1, 128>}, {pipeline_mode = #tpu.pipeline_mode<synchronous>, transform_indices = @transform_5, window_bounds = array<i64: 128, 128>}, {pipeline_mode = #tpu.pipeline_mode<synchronous>, transform_indices = @transform_6, window_bounds = array<i64: 1, 128>}, {pipeline_mode = #tpu.pipeline_mode<synchronous>, transform_indices = @transform_7, window_bounds = array<i64: 1, 128>}, {pipeline_mode = #tpu.pipeline_mode<synchronous>, transform_indices = @transform_8, window_bounds = array<i64: 1, 128>}, {pipeline_mode = #tpu.pipeline_mode<synchronous>, transform_indices = @transform_9, window_bounds = array<i64: 128, 128>}, {pipeline_mode = #tpu.pipeline_mode<synchronous>, transform_indices = @transform_10, window_bounds = array<i64: 1, 128>}, {pipeline_mode = #tpu.pipeline_mode<synchronous>, transform_indices = @transform_11, window_bounds = array<i64: 1, 128>}, {pipeline_mode = #tpu.pipeline_mode<synchronous>, transform_indices = @transform_12, window_bounds = array<i64: 1, 128>}, {pipeline_mode = #tpu.pipeline_mode<synchronous>, transform_indices = @transform_13, window_bounds = array<i64: 8, 128>}, {pipeline_mode = #tpu.pipeline_mode<synchronous>, transform_indices = @transform_14, window_bounds = array<i64: 1, 1>}, {transform_indices = @transform_15, window_bounds = array<i64: 1, 1, 8>}]} {
    %c0 = arith.constant 0 : index
    %c0_0 = arith.constant 0 : index
    %0 = vector.load %arg1[%c0, %c0_0] : memref<8x128xf32, #tpu.memory_space<vmem>>, vector<8x128xf32>
    %c0_1 = arith.constant 0 : index
    %c0_2 = arith.constant 0 : index
    %1 = vector.load %arg2[%c0_1, %c0_2] : memref<128x128xf32, #tpu.memory_space<vmem>>, vector<128x128xf32>
    %cst = arith.constant dense<0.000000e+00> : vector<8x128xf32>
    %2 = tpu.matmul %0, %1, %cst {dimension_numbers = #tpu.dot_dimension_numbers<[1], [0], [0], [1], [0, 0, 1, 1], [], []>} : vector<8x128xf32>, vector<128x128xf32>, vector<8x128xf32> -> vector<8x128xf32>
    %c0_3 = arith.constant 0 : index
    %c0_4 = arith.constant 0 : index
    %3 = vector.load %arg3[%c0_3, %c0_4] : memref<1x128xf32, #tpu.memory_space<vmem>>, vector<1x128xf32>
    %4 = vector.broadcast %3 : vector<1x128xf32> to vector<8x128xf32>
    %5 = arith.addf %2, %4 : vector<8x128xf32>
    %c0_5 = arith.constant 0 : index
    %c0_6 = arith.constant 0 : index
    %6 = vector.load %arg4[%c0_5, %c0_6] : memref<1x128xf32, #tpu.memory_space<vmem>>, vector<1x128xf32>
    %c0_7 = arith.constant 0 : index
    %c0_8 = arith.constant 0 : index
    %7 = vector.load %arg5[%c0_7, %c0_8] : memref<1x128xf32, #tpu.memory_space<vmem>>, vector<1x128xf32>
    %cst_9 = arith.constant dense<0.000000e+00> : vector<8xf32>
    %8 = vector.multi_reduction <add>, %5, %cst_9 [1] : vector<8x128xf32> to vector<8xf32>
    %9 = vector.shape_cast %8 : vector<8xf32> to vector<8x1xf32>
    %cst_10 = arith.constant 3.125000e-02 : f32
    %10 = vector.broadcast %cst_10 : f32 to vector<8x1xf32>
    %11 = arith.mulf %9, %10 : vector<8x1xf32>
    %12 = vector.broadcast %11 : vector<8x1xf32> to vector<8x128xf32>
    %13 = arith.subf %5, %12 : vector<8x128xf32>
    %14 = arith.mulf %13, %13 : vector<8x128xf32>
    %15 = tpu.iota {dimensions = array<i32: 1>} : vector<1x128xi32>
    %c32_i32 = arith.constant 32 : i32
    %16 = vector.broadcast %c32_i32 : i32 to vector<1x128xi32>
    %17 = arith.cmpi slt, %15, %16 : vector<1x128xi32>
    %18 = arith.extui %17 : vector<1x128xi1> to vector<1x128xi32>
    %19 = arith.sitofp %18 : vector<1x128xi32> to vector<1x128xf32>
    %20 = vector.broadcast %19 : vector<1x128xf32> to vector<8x128xf32>
    %21 = arith.mulf %14, %20 : vector<8x128xf32>
    %cst_11 = arith.constant dense<0.000000e+00> : vector<8xf32>
    %22 = vector.multi_reduction <add>, %21, %cst_11 [1] : vector<8x128xf32> to vector<8xf32>
    %23 = vector.shape_cast %22 : vector<8xf32> to vector<8x1xf32>
    %cst_12 = arith.constant 3.125000e-02 : f32
    %24 = vector.broadcast %cst_12 : f32 to vector<8x1xf32>
    %25 = arith.mulf %23, %24 : vector<8x1xf32>
    %cst_13 = arith.constant 9.99999974E-6 : f32
    %26 = vector.broadcast %cst_13 : f32 to vector<8x1xf32>
    %27 = arith.addf %25, %26 : vector<8x1xf32>
    %28 = math.rsqrt %27 : vector<8x1xf32>
    %29 = vector.broadcast %28 : vector<8x1xf32> to vector<8x128xf32>
    %30 = arith.mulf %13, %29 : vector<8x128xf32>
    %31 = vector.broadcast %6 : vector<1x128xf32> to vector<8x128xf32>
    %32 = arith.mulf %30, %31 : vector<8x128xf32>
    %33 = vector.broadcast %7 : vector<1x128xf32> to vector<8x128xf32>
    %34 = arith.addf %32, %33 : vector<8x128xf32>
    %cst_14 = arith.constant 0.000000e+00 : f32
    %35 = vector.broadcast %cst_14 : f32 to vector<8x128xf32>
    %36 = arith.maximumf %34, %35 : vector<8x128xf32>
    %c0_15 = arith.constant 0 : index
    %c0_16 = arith.constant 0 : index
    %37 = vector.load %arg6[%c0_15, %c0_16] : memref<128x128xf32, #tpu.memory_space<vmem>>, vector<128x128xf32>
    %cst_17 = arith.constant dense<0.000000e+00> : vector<8x128xf32>
    %38 = tpu.matmul %36, %37, %cst_17 {dimension_numbers = #tpu.dot_dimension_numbers<[1], [0], [0], [1], [0, 0, 1, 1], [], []>} : vector<8x128xf32>, vector<128x128xf32>, vector<8x128xf32> -> vector<8x128xf32>
    %c0_18 = arith.constant 0 : index
    %c0_19 = arith.constant 0 : index
    %39 = vector.load %arg7[%c0_18, %c0_19] : memref<1x128xf32, #tpu.memory_space<vmem>>, vector<1x128xf32>
    %40 = vector.broadcast %39 : vector<1x128xf32> to vector<8x128xf32>
    %41 = arith.addf %38, %40 : vector<8x128xf32>
    %c0_20 = arith.constant 0 : index
    %c0_21 = arith.constant 0 : index
    %42 = vector.load %arg8[%c0_20, %c0_21] : memref<1x128xf32, #tpu.memory_space<vmem>>, vector<1x128xf32>
    %c0_22 = arith.constant 0 : index
    %c0_23 = arith.constant 0 : index
    %43 = vector.load %arg9[%c0_22, %c0_23] : memref<1x128xf32, #tpu.memory_space<vmem>>, vector<1x128xf32>
    %cst_24 = arith.constant dense<0.000000e+00> : vector<8xf32>
    %44 = vector.multi_reduction <add>, %41, %cst_24 [1] : vector<8x128xf32> to vector<8xf32>
    %45 = vector.shape_cast %44 : vector<8xf32> to vector<8x1xf32>
    %cst_25 = arith.constant 3.125000e-02 : f32
    %46 = vector.broadcast %cst_25 : f32 to vector<8x1xf32>
    %47 = arith.mulf %45, %46 : vector<8x1xf32>
    %48 = vector.broadcast %47 : vector<8x1xf32> to vector<8x128xf32>
    %49 = arith.subf %41, %48 : vector<8x128xf32>
    %50 = arith.mulf %49, %49 : vector<8x128xf32>
    %51 = tpu.iota {dimensions = array<i32: 1>} : vector<1x128xi32>
    %c32_i32_26 = arith.constant 32 : i32
    %52 = vector.broadcast %c32_i32_26 : i32 to vector<1x128xi32>
    %53 = arith.cmpi slt, %51, %52 : vector<1x128xi32>
    %54 = arith.extui %53 : vector<1x128xi1> to vector<1x128xi32>
    %55 = arith.sitofp %54 : vector<1x128xi32> to vector<1x128xf32>
    %56 = vector.broadcast %55 : vector<1x128xf32> to vector<8x128xf32>
    %57 = arith.mulf %50, %56 : vector<8x128xf32>
    %cst_27 = arith.constant dense<0.000000e+00> : vector<8xf32>
    %58 = vector.multi_reduction <add>, %57, %cst_27 [1] : vector<8x128xf32> to vector<8xf32>
    %59 = vector.shape_cast %58 : vector<8xf32> to vector<8x1xf32>
    %cst_28 = arith.constant 3.125000e-02 : f32
    %60 = vector.broadcast %cst_28 : f32 to vector<8x1xf32>
    %61 = arith.mulf %59, %60 : vector<8x1xf32>
    %cst_29 = arith.constant 9.99999974E-6 : f32
    %62 = vector.broadcast %cst_29 : f32 to vector<8x1xf32>
    %63 = arith.addf %61, %62 : vector<8x1xf32>
    %64 = math.rsqrt %63 : vector<8x1xf32>
    %65 = vector.broadcast %64 : vector<8x1xf32> to vector<8x128xf32>
    %66 = arith.mulf %49, %65 : vector<8x128xf32>
    %67 = vector.broadcast %42 : vector<1x128xf32> to vector<8x128xf32>
    %68 = arith.mulf %66, %67 : vector<8x128xf32>
    %69 = vector.broadcast %43 : vector<1x128xf32> to vector<8x128xf32>
    %70 = arith.addf %68, %69 : vector<8x128xf32>
    %cst_30 = arith.constant 0.000000e+00 : f32
    %71 = vector.broadcast %cst_30 : f32 to vector<8x128xf32>
    %72 = arith.maximumf %70, %71 : vector<8x128xf32>
    %c0_31 = arith.constant 0 : index
    %c0_32 = arith.constant 0 : index
    %73 = vector.load %arg10[%c0_31, %c0_32] : memref<128x128xf32, #tpu.memory_space<vmem>>, vector<128x128xf32>
    %cst_33 = arith.constant dense<0.000000e+00> : vector<8x128xf32>
    %74 = tpu.matmul %72, %73, %cst_33 {dimension_numbers = #tpu.dot_dimension_numbers<[1], [0], [0], [1], [0, 0, 1, 1], [], []>} : vector<8x128xf32>, vector<128x128xf32>, vector<8x128xf32> -> vector<8x128xf32>
    %c0_34 = arith.constant 0 : index
    %c0_35 = arith.constant 0 : index
    %75 = vector.load %arg11[%c0_34, %c0_35] : memref<1x128xf32, #tpu.memory_space<vmem>>, vector<1x128xf32>
    %76 = vector.broadcast %75 : vector<1x128xf32> to vector<8x128xf32>
    %77 = arith.addf %74, %76 : vector<8x128xf32>
    %c0_36 = arith.constant 0 : index
    %c0_37 = arith.constant 0 : index
    %78 = vector.load %arg12[%c0_36, %c0_37] : memref<1x128xf32, #tpu.memory_space<vmem>>, vector<1x128xf32>
    %c0_38 = arith.constant 0 : index
    %c0_39 = arith.constant 0 : index
    %79 = vector.load %arg13[%c0_38, %c0_39] : memref<1x128xf32, #tpu.memory_space<vmem>>, vector<1x128xf32>
    %cst_40 = arith.constant dense<0.000000e+00> : vector<8xf32>
    %80 = vector.multi_reduction <add>, %77, %cst_40 [1] : vector<8x128xf32> to vector<8xf32>
    %81 = vector.shape_cast %80 : vector<8xf32> to vector<8x1xf32>
    %cst_41 = arith.constant 6.250000e-02 : f32
    %82 = vector.broadcast %cst_41 : f32 to vector<8x1xf32>
    %83 = arith.mulf %81, %82 : vector<8x1xf32>
    %84 = vector.broadcast %83 : vector<8x1xf32> to vector<8x128xf32>
    %85 = arith.subf %77, %84 : vector<8x128xf32>
    %86 = arith.mulf %85, %85 : vector<8x128xf32>
    %87 = tpu.iota {dimensions = array<i32: 1>} : vector<1x128xi32>
    %c16_i32 = arith.constant 16 : i32
    %88 = vector.broadcast %c16_i32 : i32 to vector<1x128xi32>
    %89 = arith.cmpi slt, %87, %88 : vector<1x128xi32>
    %90 = arith.extui %89 : vector<1x128xi1> to vector<1x128xi32>
    %91 = arith.sitofp %90 : vector<1x128xi32> to vector<1x128xf32>
    %92 = vector.broadcast %91 : vector<1x128xf32> to vector<8x128xf32>
    %93 = arith.mulf %86, %92 : vector<8x128xf32>
    %cst_42 = arith.constant dense<0.000000e+00> : vector<8xf32>
    %94 = vector.multi_reduction <add>, %93, %cst_42 [1] : vector<8x128xf32> to vector<8xf32>
    %95 = vector.shape_cast %94 : vector<8xf32> to vector<8x1xf32>
    %cst_43 = arith.constant 6.250000e-02 : f32
    %96 = vector.broadcast %cst_43 : f32 to vector<8x1xf32>
    %97 = arith.mulf %95, %96 : vector<8x1xf32>
    %cst_44 = arith.constant 9.99999974E-6 : f32
    %98 = vector.broadcast %cst_44 : f32 to vector<8x1xf32>
    %99 = arith.addf %97, %98 : vector<8x1xf32>
    %100 = math.rsqrt %99 : vector<8x1xf32>
    %101 = vector.broadcast %100 : vector<8x1xf32> to vector<8x128xf32>
    %102 = arith.mulf %85, %101 : vector<8x128xf32>
    %103 = vector.broadcast %78 : vector<1x128xf32> to vector<8x128xf32>
    %104 = arith.mulf %102, %103 : vector<8x128xf32>
    %105 = vector.broadcast %79 : vector<1x128xf32> to vector<8x128xf32>
    %106 = arith.addf %104, %105 : vector<8x128xf32>
    %cst_45 = arith.constant 0.000000e+00 : f32
    %107 = vector.broadcast %cst_45 : f32 to vector<8x128xf32>
    %108 = arith.maximumf %106, %107 : vector<8x128xf32>
    %c0_46 = arith.constant 0 : index
    %c0_47 = arith.constant 0 : index
    %109 = vector.load %arg14[%c0_46, %c0_47] : memref<8x128xf32, #tpu.memory_space<vmem>>, vector<8x128xf32>
    %cst_48 = arith.constant dense<0.000000e+00> : vector<8x8xf32>
    %110 = tpu.matmul %109, %108, %cst_48 {dimension_numbers = #tpu.dot_dimension_numbers<[1], [1], [0], [0], [0, 0, 1, 0], [], []>} : vector<8x128xf32>, vector<8x128xf32>, vector<8x8xf32> -> vector<8x8xf32>
    %111 = vector.extract_strided_slice %110 {offsets = [0, 0], sizes = [1, 8], strides = [1, 1]} : vector<8x8xf32> to vector<1x8xf32>
    %c0_49 = arith.constant 0 : index
    %c0_50 = arith.constant 0 : index
    %112 = vector.load %arg15[%c0_49, %c0_50] : memref<1x1xf32, #tpu.memory_space<vmem>>, vector<1x1xf32>
    %113 = vector.broadcast %112 : vector<1x1xf32> to vector<1x8xf32>
    %114 = arith.addf %111, %113 : vector<1x8xf32>
    %115 = vector.shape_cast %114 : vector<1x8xf32> to vector<1x1x8xf32>
    %c0_51 = arith.constant 0 : index
    %c0_52 = arith.constant 0 : index
    %c0_53 = arith.constant 0 : index
    %116 = vector.load %arg16[%c0_51, %c0_52, %c0_53] : memref<1x1x8xf32, #tpu.memory_space<vmem>>, vector<1x1x8xf32>
    tpu.vector_store %arg16[%c0_51, %c0_52, %c0_53], %115 {strides = array<i32>} : memref<1x1x8xf32, #tpu.memory_space<vmem>>, vector<1x1x8xf32>,
    return
  }
  func.func @transform_0(%arg0: i32) -> (i32, i32) {
    %c0_i32 = arith.constant 0 : i32
    %c0_i32_0 = arith.constant 0 : i32
    return %arg0, %c0_i32 : i32, i32
  }
  func.func @transform_1(%arg0: i32) -> (i32, i32) {
    %c0_i32 = arith.constant 0 : i32
    %c0_i32_0 = arith.constant 0 : i32
    %c0_i32_1 = arith.constant 0 : i32
    return %c0_i32, %c0_i32_0 : i32, i32
  }
  func.func @transform_2(%arg0: i32) -> (i32, i32) {
    %c0_i32 = arith.constant 0 : i32
    %c0_i32_0 = arith.constant 0 : i32
    %c0_i32_1 = arith.constant 0 : i32
    return %c0_i32, %c0_i32_0 : i32, i32
  }
  func.func @transform_3(%arg0: i32) -> (i32, i32) {
    %c0_i32 = arith.constant 0 : i32
    %c0_i32_0 = arith.constant 0 : i32
    %c0_i32_1 = arith.constant 0 : i32
    return %c0_i32, %c0_i32_0 : i32, i32
  }
  func.func @transform_4(%arg0: i32) -> (i32, i32) {
    %c0_i32 = arith.constant 0 : i32
    %c0_i32_0 = arith.constant 0 : i32
    %c0_i32_1 = arith.constant 0 : i32
    return %c0_i32, %c0_i32_0 : i32, i32
  }
  func.func @transform_5(%arg0: i32) -> (i32, i32) {
    %c0_i32 = arith.constant 0 : i32
    %c0_i32_0 = arith.constant 0 : i32
    %c0_i32_1 = arith.constant 0 : i32
    return %c0_i32, %c0_i32_0 : i32, i32
  }
  func.func @transform_6(%arg0: i32) -> (i32, i32) {
    %c0_i32 = arith.constant 0 : i32
    %c0_i32_0 = arith.constant 0 : i32
    %c0_i32_1 = arith.constant 0 : i32
    return %c0_i32, %c0_i32_0 : i32, i32
  }
  func.func @transform_7(%arg0: i32) -> (i32, i32) {
    %c0_i32 = arith.constant 0 : i32
    %c0_i32_0 = arith.constant 0 : i32
    %c0_i32_1 = arith.constant 0 : i32
    return %c0_i32, %c0_i32_0 : i32, i32
  }
  func.func @transform_8(%arg0: i32) -> (i32, i32) {
    %c0_i32 = arith.constant 0 : i32
    %c0_i32_0 = arith.constant 0 : i32
    %c0_i32_1 = arith.constant 0 : i32
    return %c0_i32, %c0_i32_0 : i32, i32
  }
  func.func @transform_9(%arg0: i32) -> (i32, i32) {
    %c0_i32 = arith.constant 0 : i32
    %c0_i32_0 = arith.constant 0 : i32
    %c0_i32_1 = arith.constant 0 : i32
    return %c0_i32, %c0_i32_0 : i32, i32
  }
  func.func @transform_10(%arg0: i32) -> (i32, i32) {
    %c0_i32 = arith.constant 0 : i32
    %c0_i32_0 = arith.constant 0 : i32
    %c0_i32_1 = arith.constant 0 : i32
    return %c0_i32, %c0_i32_0 : i32, i32
  }
  func.func @transform_11(%arg0: i32) -> (i32, i32) {
    %c0_i32 = arith.constant 0 : i32
    %c0_i32_0 = arith.constant 0 : i32
    %c0_i32_1 = arith.constant 0 : i32
    return %c0_i32, %c0_i32_0 : i32, i32
  }
  func.func @transform_12(%arg0: i32) -> (i32, i32) {
    %c0_i32 = arith.constant 0 : i32
    %c0_i32_0 = arith.constant 0 : i32
    %c0_i32_1 = arith.constant 0 : i32
    return %c0_i32, %c0_i32_0 : i32, i32
  }
  func.func @transform_13(%arg0: i32) -> (i32, i32) {
    %c0_i32 = arith.constant 0 : i32
    %c0_i32_0 = arith.constant 0 : i32
    %c0_i32_1 = arith.constant 0 : i32
    return %c0_i32, %c0_i32_0 : i32, i32
  }
  func.func @transform_14(%arg0: i32) -> (i32, i32) {
    %c0_i32 = arith.constant 0 : i32
    %c0_i32_0 = arith.constant 0 : i32
    %c0_i32_1 = arith.constant 0 : i32
    return %c0_i32, %c0_i32_0 : i32, i32
  }
  func.func @transform_15(%arg0: i32) -> (i32, i32, i32) {
    %c0_i32 = arith.constant 0 : i32
    %c0_i32_0 = arith.constant 0 : i32
    %c0_i32_1 = arith.constant 0 : i32
    return %arg0, %c0_i32, %c0_i32_0 : i32, i32, i32
  }
}

</mosaic_0001>

<bundles_post_ra>
// kernel: tpu_custom_call.1
= control target key start
LH: loop header
LB: loop body
LE: loop exit
PB: predicated region body
PF: predicated region fallthrough
CT: control target
= control target key end

     0   :  { %s1662_s0 = inlined_call_operand.hbm [shape: f32[8,128], index: 0, kind: input, shape index: {}]   ;;  %s1663_s1 = inlined_call_operand.hbm [shape: f32[128,128], index: 1, kind: input, shape index: {}]   ;;  %s1664_s2 = inlined_call_operand.hbm [shape: f32[1,128], index: 2, kind: input, shape index: {}]   ;;  %s1665_s3 = inlined_call_operand.hbm [shape: f32[1,128], index: 3, kind: input, shape index: {}]   ;;  %s1666_s4 = inlined_call_operand.hbm [shape: f32[1,128], index: 4, kind: input, shape index: {}]   ;;  %s1667_s5 = inlined_call_operand.hbm [shape: f32[128,128], index: 5, kind: input, shape index: {}]   ;;  %s1668_s6 = inlined_call_operand.hbm [shape: f32[1,128], index: 6, kind: input, shape index: {}]   ;;  %s1669_s7 = inlined_call_operand.hbm [shape: f32[1,128], index: 7, kind: input, shape index: {}]   ;;  %s1670_s8 = inlined_call_operand.hbm [shape: f32[1,128], index: 8, kind: input, shape index: {}]   ;;  %s1671_s9 = inlined_call_operand.hbm [shape: f32[128,128], index: 9, kind: input, shape index: {}]   ;;  %s1672_s10 = inlined_call_operand.hbm [shape: f32[1,128], index: 10, kind: input, shape index: {}]   ;;  %s1673_s11 = inlined_call_operand.hbm [shape: f32[1,128], index: 11, kind: input, shape index: {}]   ;;  %s1674_s12 = inlined_call_operand.hbm [shape: f32[1,128], index: 12, kind: input, shape index: {}]   ;;  %s1675_s13 = inlined_call_operand.hbm [shape: f32[8,128], index: 13, kind: input, shape index: {}]   ;;  %s1676_s14 = inlined_call_operand.<no memory space> [shape: f32[1,1], index: 14, kind: input, shape index: {}]   ;;  %s1677_s15 = inlined_call_operand.hbm [shape: f32[1,1,8], index: 15, kind: output, shape index: {}]  }
   0x1   :  { %v20_v0 = vstv %s1676_s14 }
   0x2   :  { %21 = vst [vmem:[#allocation2] sm:$0x1] %v20_v0 }
   0x3   :  { %22 = vsyncpa [#allocation4], 0 }
   0x4   :  { %23 = vsyncpa [#allocation7], 0 }
   0x5   :  { %24 = vsyncpa [#allocation10], 0 }
   0x6   :  { %25 = vsyncpa [#allocation13], 0 }
   0x7   :  { %26 = vsyncpa [#allocation16], 0 }
   0x8   :  { %27 = vsyncpa [#allocation19], 0 }
   0x9   :  { %28 = vsyncpa [#allocation22], 0 }
   0xa   :  { %29 = vsyncpa [#allocation25], 0 }
   0xb   :  { %30 = vsyncpa [#allocation5], 0  ;;  %s1324_s20 = smov [#allocation6]   ;;  %s976_s24 = scalar_lea.hbm %s1663_s1, 2048 }
   0xc   :  { %s46_s21 = sshll.u32 %s1324_s20, 4  ;;  %p977_p0 = scmp.ne.s32.totalorder %s1663_s1, %s976_s24  ;;  %s47_s21 = int_to_ptr.vmem [resolvable:$true] %s46_s21 }
   0xd   :  { %p980_p1 = scmp.lt.u32.totalorder %s976_s24, %s1663_s1 }
   0xf   :  { %p982_p2 = pnand %p980_p1, %p977_p0 }
  0x11   :  { %985 = shalt.err (!%p982_p2)
}
  0x12   :  { %s986_s28 = scalar_lea.vmem %s47_s21, 2048  ;;  %p991_p4 = scmp.lt.s32.totalorder %s47_s21, %s47_s21 }
  0x13   :  { %p987_p3 = scmp.ne.s32.totalorder %s47_s21, %s986_s28  ;;  %p992_p5 = scmp.lt.s32.totalorder %s986_s28, %s986_s28 }
  0x15   :  { %p993_p6 = por %p992_p5, %p991_p4 }
  0x17   :  { %p994_p7 = pnand %p993_p6, %p987_p3 }
  0x19   :  { %997 = shalt.err (!%p994_p7)
}
  0x1a   :  { %s1325_s29 = smov 128   ;;  %s1326_s30 = smov 8  }
  0x1b   :  { %52 = dma.hbm_to_vmem [thread:$0]  %s1663_s1, 2048, %s47_s21, [#allocation7], %s1325_s29, %s1325_s29, %s1326_s30  }
  0x1c   :  { %s1327_s18 = smov [#allocation9]   ;;  %s1328_s20 = smov [#allocation12]  }
  0x1d   :  { %s69_s19 = sshll.u32 %s1327_s18, 4  ;;  %s88_s22 = sshll.u32 %s1328_s20, 4  ;;  %s70_s19 = int_to_ptr.vmem [resolvable:$true] %s69_s19  ;;  %s89_s22 = int_to_ptr.vmem [resolvable:$true] %s88_s22 }
  0x1e   :  { %s998_s25 = scalar_lea.hbm %s1665_s3, 16 }
  0x1f   :  { %p999_p8 = scmp.ne.s32.totalorder %s1665_s3, %s998_s25  ;;  %p1002_p9 = scmp.lt.u32.totalorder %s998_s25, %s1665_s3 }
  0x21   :  { %p1004_p10 = pnand %p1002_p9, %p999_p8 }
  0x23   :  { %1007 = shalt.err (!%p1004_p10)
}
  0x24   :  { %s1008_s1 = scalar_lea.vmem %s70_s19, 16  ;;  %s1012_s21 = scalar_lea.vmem %s70_s19, 32 }
  0x25   :  { %p1009_p11 = scmp.ne.s32.totalorder %s70_s19, %s1008_s1  ;;  %p1013_p12 = scmp.lt.s32.totalorder %s70_s19, %s70_s19 }
  0x26   :  { %p1014_p13 = scmp.lt.s32.totalorder %s1012_s21, %s1008_s1 }
  0x28   :  { %p1015_p0 = por %p1014_p13, %p1013_p12 }
  0x2a   :  { %p1016_p1 = pnand %p1015_p0, %p1009_p11 }
  0x2c   :  { %1019 = shalt.err (!%p1016_p1)
}
  0x2d   :  { %72 = dma.hbm_to_vmem [thread:$0]  %s1665_s3, 16, %s70_s19, [#allocation10]  }
  0x2e   :  { %s1020_s23 = scalar_lea.hbm %s1667_s5, 2048 }
  0x2f   :  { %p1021_p2 = scmp.ne.s32.totalorder %s1667_s5, %s1020_s23  ;;  %p1024_p3 = scmp.lt.u32.totalorder %s1020_s23, %s1667_s5 }
  0x31   :  { %p1026_p4 = pnand %p1024_p3, %p1021_p2 }
  0x33   :  { %1029 = shalt.err (!%p1026_p4)
}
  0x34   :  { %s1030_s27 = scalar_lea.vmem %s89_s22, 2048  ;;  %p1035_p6 = scmp.lt.s32.totalorder %s89_s22, %s89_s22 }
  0x35   :  { %p1031_p5 = scmp.ne.s32.totalorder %s89_s22, %s1030_s27  ;;  %p1036_p7 = scmp.lt.s32.totalorder %s1030_s27, %s1030_s27 }
  0x37   :  { %p1037_p8 = por %p1036_p7, %p1035_p6 }
  0x39   :  { %p1038_p9 = pnand %p1037_p8, %p1031_p5 }
  0x3b   :  { %1041 = shalt.err (!%p1038_p9)
}
  0x3c   :  { %94 = dma.hbm_to_vmem [thread:$0]  %s1667_s5, 2048, %s89_s22, [#allocation13], %s1325_s29, %s1325_s29, %s1326_s30  }
  0x3d   :  { %s1329_s28 = smov [#allocation15]   ;;  %s1330_s21 = smov [#allocation18]  }
  0x3e   :  { %s111_s1 = sshll.u32 %s1329_s28, 4  ;;  %s130_s16 = sshll.u32 %s1330_s21, 4  ;;  %s112_s1 = int_to_ptr.vmem [resolvable:$true] %s111_s1  ;;  %s131_s16 = int_to_ptr.vmem [resolvable:$true] %s130_s16 }
  0x3f   :  { %s1042_s20 = scalar_lea.hbm %s1669_s7, 16 }
  0x40   :  { %p1043_p10 = scmp.ne.s32.totalorder %s1669_s7, %s1042_s20  ;;  %p1046_p11 = scmp.lt.u32.totalorder %s1042_s20, %s1669_s7 }
  0x42   :  { %p1048_p12 = pnand %p1046_p11, %p1043_p10 }
  0x44   :  { %1051 = shalt.err (!%p1048_p12)
}
  0x45   :  { %s1052_s5 = scalar_lea.vmem %s112_s1, 16  ;;  %s1056_s22 = scalar_lea.vmem %s112_s1, 32 }
  0x46   :  { %p1053_p13 = scmp.ne.s32.totalorder %s112_s1, %s1052_s5  ;;  %p1057_p0 = scmp.lt.s32.totalorder %s112_s1, %s112_s1 }
  0x47   :  { %p1058_p1 = scmp.lt.s32.totalorder %s1056_s22, %s1052_s5 }
  0x49   :  { %p1059_p2 = por %p1058_p1, %p1057_p0 }
  0x4b   :  { %p1060_p3 = pnand %p1059_p2, %p1053_p13 }
  0x4d   :  { %1063 = shalt.err (!%p1060_p3)
}
  0x4e   :  { %114 = dma.hbm_to_vmem [thread:$0]  %s1669_s7, 16, %s112_s1, [#allocation16]  }
  0x4f   :  { %s1064_s28 = scalar_lea.hbm %s1671_s9, 2048 }
  0x50   :  { %p1065_p4 = scmp.ne.s32.totalorder %s1671_s9, %s1064_s28  ;;  %p1068_p5 = scmp.lt.u32.totalorder %s1064_s28, %s1671_s9 }
  0x52   :  { %p1070_p6 = pnand %p1068_p5, %p1065_p4 }
  0x54   :  { %1073 = shalt.err (!%p1070_p6)
}
  0x55   :  { %s1074_s23 = scalar_lea.vmem %s131_s16, 2048  ;;  %p1079_p8 = scmp.lt.s32.totalorder %s131_s16, %s131_s16 }
  0x56   :  { %p1075_p7 = scmp.ne.s32.totalorder %s131_s16, %s1074_s23  ;;  %p1080_p9 = scmp.lt.s32.totalorder %s1074_s23, %s1074_s23 }
  0x58   :  { %p1081_p10 = por %p1080_p9, %p1079_p8 }
  0x5a   :  { %p1082_p11 = pnand %p1081_p10, %p1075_p7 }
  0x5c   :  { %1085 = shalt.err (!%p1082_p11)
}
  0x5d   :  { %136 = dma.hbm_to_vmem [thread:$0]  %s1671_s9, 2048, %s131_s16, [#allocation19], %s1325_s29, %s1325_s29, %s1326_s30  }
  0x5e   :  { %s1331_s24 = smov [#allocation21]   ;;  %s1332_s26 = smov [#allocation3]  }
  0x5f   :  { %s153_s25 = sshll.u32 %s1331_s24, 4  ;;  %s37_s5 = sshll.u32 %s1332_s26, 4  ;;  %s154_s25 = int_to_ptr.vmem [resolvable:$true] %s153_s25  ;;  %s38_s5 = int_to_ptr.vmem [resolvable:$true] %s37_s5 }
  0x60   :  { %s1086_s27 = scalar_lea.hbm %s1673_s11, 16 }
  0x61   :  { %p1087_p12 = scmp.ne.s32.totalorder %s1673_s11, %s1086_s27  ;;  %p1090_p13 = scmp.lt.u32.totalorder %s1086_s27, %s1673_s11 }
  0x63   :  { %p1092_p0 = pnand %p1090_p13, %p1087_p12 }
  0x65   :  { %1095 = shalt.err (!%p1092_p0)
}
  0x66   :  { %s1096_s9 = scalar_lea.vmem %s154_s25, 16  ;;  %s1100_s29 = scalar_lea.vmem %s154_s25, 32 }
  0x67   :  { %p1097_p1 = scmp.ne.s32.totalorder %s154_s25, %s1096_s9  ;;  %p1101_p2 = scmp.lt.s32.totalorder %s154_s25, %s154_s25 }
  0x68   :  { %p1102_p3 = scmp.lt.s32.totalorder %s1100_s29, %s1096_s9 }
  0x6a   :  { %p1103_p4 = por %p1102_p3, %p1101_p2 }
  0x6c   :  { %p1104_p5 = pnand %p1103_p4, %p1097_p1 }
  0x6e   :  { %1107 = shalt.err (!%p1104_p5)
}
  0x6f   :  { %156 = dma.hbm_to_vmem [thread:$0]  %s1673_s11, 16, %s154_s25, [#allocation22]  }
  0x70   :  { %s1108_s20 = scalar_lea.hbm %s1662_s0, 128 }
  0x71   :  { %p1109_p6 = scmp.ne.s32.totalorder %s1662_s0, %s1108_s20  ;;  %p1112_p7 = scmp.lt.u32.totalorder %s1108_s20, %s1662_s0 }
  0x73   :  { %p1114_p8 = pnand %p1112_p7, %p1109_p6 }
  0x75   :  { %1117 = shalt.err (!%p1114_p8)
}
  0x76   :  { %s1118_s26 = scalar_lea.vmem %s38_s5, 128  ;;  %p1123_p10 = scmp.lt.s32.totalorder %s38_s5, %s38_s5 }
  0x77   :  { %p1119_p9 = scmp.ne.s32.totalorder %s38_s5, %s1118_s26  ;;  %p1124_p11 = scmp.lt.s32.totalorder %s1118_s26, %s1118_s26 }
  0x79   :  { %p1125_p12 = por %p1124_p11, %p1123_p10 }
  0x7b   :  { %p1126_p13 = pnand %p1125_p12, %p1119_p9 }
  0x7d   :  { %1129 = shalt.err (!%p1126_p13)
}
  0x7e   :  { %40 = dma.hbm_to_vmem [thread:$0]  %s1662_s0, 128, %s38_s5, [#allocation4]  }
  0x7f   :  { %s1333_s22 = smov [#allocation8]   ;;  %s1334_s27 = smov [#allocation11]  }
  0x80   :  { %s59_s14 = sshll.u32 %s1333_s22, 4  ;;  %s79_s3 = sshll.u32 %s1334_s27, 4  ;;  %s60_s14 = int_to_ptr.vmem [resolvable:$true] %s59_s14  ;;  %s80_s3 = int_to_ptr.vmem [resolvable:$true] %s79_s3 }
  0x81   :  { %s1130_s21 = scalar_lea.hbm %s1664_s2, 16 }
  0x82   :  { %p1131_p0 = scmp.ne.s32.totalorder %s1664_s2, %s1130_s21  ;;  %p1134_p1 = scmp.lt.u32.totalorder %s1130_s21, %s1664_s2 }
  0x84   :  { %p1136_p2 = pnand %p1134_p1, %p1131_p0 }
  0x86   :  { %1139 = shalt.err (!%p1136_p2)
}
  0x87   :  { %s1140_s0 = scalar_lea.vmem %s60_s14, 16  ;;  %s1144_s5 = scalar_lea.vmem %s60_s14, 32 }
  0x88   :  { %p1141_p3 = scmp.ne.s32.totalorder %s60_s14, %s1140_s0  ;;  %p1145_p4 = scmp.lt.s32.totalorder %s60_s14, %s60_s14 }
  0x89   :  { %p1146_p5 = scmp.lt.s32.totalorder %s1144_s5, %s1140_s0 }
  0x8b   :  { %p1147_p6 = por %p1146_p5, %p1145_p4 }
  0x8d   :  { %p1148_p7 = pnand %p1147_p6, %p1141_p3 }
  0x8f   :  { %1151 = shalt.err (!%p1148_p7)
}
  0x90   :  { %62 = dma.hbm_to_vmem [thread:$0]  %s1664_s2, 16, %s60_s14, [#allocation7]  }
  0x91   :  { %s1152_s7 = scalar_lea.hbm %s1666_s4, 16 }
  0x92   :  { %p1153_p8 = scmp.ne.s32.totalorder %s1666_s4, %s1152_s7  ;;  %p1156_p9 = scmp.lt.u32.totalorder %s1152_s7, %s1666_s4 }
  0x94   :  { %p1158_p10 = pnand %p1156_p9, %p1153_p8 }
  0x96   :  { %1161 = shalt.err (!%p1158_p10)
}
  0x97   :  { %s1162_s25 = scalar_lea.vmem %s80_s3, 16  ;;  %s1166_s22 = scalar_lea.vmem %s80_s3, 32 }
  0x98   :  { %p1163_p11 = scmp.ne.s32.totalorder %s80_s3, %s1162_s25  ;;  %p1167_p12 = scmp.lt.s32.totalorder %s80_s3, %s80_s3 }
  0x99   :  { %p1168_p13 = scmp.lt.s32.totalorder %s1166_s22, %s1162_s25 }
  0x9b   :  { %p1169_p0 = por %p1168_p13, %p1167_p12 }
  0x9d   :  { %p1170_p1 = pnand %p1169_p0, %p1163_p11 }
  0x9f   :  { %1173 = shalt.err (!%p1170_p1)
}
  0xa0   :  { %82 = dma.hbm_to_vmem [thread:$0]  %s1666_s4, 16, %s80_s3, [#allocation10]  }
  0xa1   :  { %s1335_s27 = smov [#allocation14]   ;;  %s1336_s28 = smov [#allocation17]  }
  0xa2   :  { %s101_s19 = sshll.u32 %s1335_s27, 4  ;;  %s121_s21 = sshll.u32 %s1336_s28, 4  ;;  %s102_s19 = int_to_ptr.vmem [resolvable:$true] %s101_s19  ;;  %s122_s21 = int_to_ptr.vmem [resolvable:$true] %s121_s21 }
  0xa3   :  { %s1174_s30 = scalar_lea.hbm %s1668_s6, 16 }
  0xa4   :  { %p1175_p2 = scmp.ne.s32.totalorder %s1668_s6, %s1174_s30  ;;  %p1178_p3 = scmp.lt.u32.totalorder %s1174_s30, %s1668_s6 }
  0xa6   :  { %p1180_p4 = pnand %p1178_p3, %p1175_p2 }
  0xa8   :  { %1183 = shalt.err (!%p1180_p4)
}
  0xa9   :  { %s1184_s4 = scalar_lea.vmem %s102_s19, 16  ;;  %s1188_s3 = scalar_lea.vmem %s102_s19, 32 }
  0xaa   :  { %p1185_p5 = scmp.ne.s32.totalorder %s102_s19, %s1184_s4  ;;  %p1189_p6 = scmp.lt.s32.totalorder %s102_s19, %s102_s19 }
  0xab   :  { %p1190_p7 = scmp.lt.s32.totalorder %s1188_s3, %s1184_s4 }
  0xad   :  { %p1191_p8 = por %p1190_p7, %p1189_p6 }
  0xaf   :  { %p1192_p9 = pnand %p1191_p8, %p1185_p5 }
  0xb1   :  { %1195 = shalt.err (!%p1192_p9)
}
  0xb2   :  { %104 = dma.hbm_to_vmem [thread:$0]  %s1668_s6, 16, %s102_s19, [#allocation13]  }
  0xb3   :  { %s1196_s1 = scalar_lea.hbm %s1670_s8, 16 }
  0xb4   :  { %p1197_p10 = scmp.ne.s32.totalorder %s1670_s8, %s1196_s1  ;;  %p1200_p11 = scmp.lt.u32.totalorder %s1196_s1, %s1670_s8 }
  0xb6   :  { %p1202_p12 = pnand %p1200_p11, %p1197_p10 }
  0xb8   :  { %1205 = shalt.err (!%p1202_p12)
}
  0xb9   :  { %s1206_s22 = scalar_lea.vmem %s122_s21, 16  ;;  %s1210_s2 = scalar_lea.vmem %s122_s21, 32 }
  0xba   :  { %p1207_p13 = scmp.ne.s32.totalorder %s122_s21, %s1206_s22  ;;  %p1211_p0 = scmp.lt.s32.totalorder %s122_s21, %s122_s21 }
  0xbb   :  { %p1212_p1 = scmp.lt.s32.totalorder %s1210_s2, %s1206_s22 }
  0xbd   :  { %p1213_p2 = por %p1212_p1, %p1211_p0 }
  0xbf   :  { %p1214_p3 = pnand %p1213_p2, %p1207_p13 }
  0xc1   :  { %1217 = shalt.err (!%p1214_p3)
}
  0xc2   :  { %124 = dma.hbm_to_vmem [thread:$0]  %s1670_s8, 16, %s122_s21, [#allocation16]  }
  0xc3   :  { %s1337_s27 = smov [#allocation20]   ;;  %s1338_s28 = smov [#allocation23]  }
  0xc4   :  { %s143_s19 = sshll.u32 %s1337_s27, 4  ;;  %s163_s9 = sshll.u32 %s1338_s28, 4  ;;  %s144_s19 = int_to_ptr.vmem [resolvable:$true] %s143_s19  ;;  %s164_s9 = int_to_ptr.vmem [resolvable:$true] %s163_s9 }
  0xc5   :  { %s1218_s16 = scalar_lea.hbm %s1672_s10, 16 }
  0xc6   :  { %p1219_p4 = scmp.ne.s32.totalorder %s1672_s10, %s1218_s16  ;;  %p1222_p5 = scmp.lt.u32.totalorder %s1218_s16, %s1672_s10 }
  0xc8   :  { %p1224_p6 = pnand %p1222_p5, %p1219_p4 }
  0xca   :  { %1227 = shalt.err (!%p1224_p6)
}
  0xcb   :  { %s1228_s8 = scalar_lea.vmem %s144_s19, 16  ;;  %s1232_s21 = scalar_lea.vmem %s144_s19, 32 }
  0xcc   :  { %p1229_p7 = scmp.ne.s32.totalorder %s144_s19, %s1228_s8  ;;  %p1233_p8 = scmp.lt.s32.totalorder %s144_s19, %s144_s19 }
  0xcd   :  { %p1234_p9 = scmp.lt.s32.totalorder %s1232_s21, %s1228_s8 }
  0xcf   :  { %p1235_p10 = por %p1234_p9, %p1233_p8 }
  0xd1   :  { %p1236_p11 = pnand %p1235_p10, %p1229_p7 }
  0xd3   :  { %1239 = shalt.err (!%p1236_p11)
}
  0xd4   :  { %146 = dma.hbm_to_vmem [thread:$0]  %s1672_s10, 16, %s144_s19, [#allocation19]  }
  0xd5   :  { %s1240_s7 = scalar_lea.hbm %s1674_s12, 16 }
  0xd6   :  { %p1241_p12 = scmp.ne.s32.totalorder %s1674_s12, %s1240_s7  ;;  %p1244_p13 = scmp.lt.u32.totalorder %s1240_s7, %s1674_s12 }
  0xd8   :  { %p1246_p0 = pnand %p1244_p13, %p1241_p12 }
  0xda   :  { %1249 = shalt.err (!%p1246_p0)
}
  0xdb   :  { %s1250_s25 = scalar_lea.vmem %s164_s9, 16  ;;  %s1254_s22 = scalar_lea.vmem %s164_s9, 32 }
  0xdc   :  { %p1251_p1 = scmp.ne.s32.totalorder %s164_s9, %s1250_s25  ;;  %p1255_p2 = scmp.lt.s32.totalorder %s164_s9, %s164_s9 }
  0xdd   :  { %p1256_p3 = scmp.lt.s32.totalorder %s1254_s22, %s1250_s25 }
  0xdf   :  { %p1257_p4 = por %p1256_p3, %p1255_p2 }
  0xe1   :  { %p1258_p5 = pnand %p1257_p4, %p1251_p1 }
  0xe3   :  { %1261 = shalt.err (!%p1258_p5)
}
  0xe4   :  { %166 = dma.hbm_to_vmem [thread:$0]  %s1674_s12, 16, %s164_s9, [#allocation22]  }
  0xe5   :  { %s1339_s6 = smov [#allocation24]   ;;  %s1262_s28 = scalar_lea.hbm %s1675_s13, 128 }
  0xe6   :  { %s173_s14 = sshll.u32 %s1339_s6, 4  ;;  %p1263_p6 = scmp.ne.s32.totalorder %s1675_s13, %s1262_s28  ;;  %s174_s14 = int_to_ptr.vmem [resolvable:$true] %s173_s14 }
  0xe7   :  { %p1266_p7 = scmp.lt.u32.totalorder %s1262_s28, %s1675_s13 }
  0xe9   :  { %p1268_p8 = pnand %p1266_p7, %p1263_p6 }
  0xeb   :  { %1271 = shalt.err (!%p1268_p8)
}
  0xec   :  { %s1272_s5 = scalar_lea.vmem %s174_s14, 128  ;;  %p1277_p10 = scmp.lt.s32.totalorder %s174_s14, %s174_s14 }
  0xed   :  { %p1273_p9 = scmp.ne.s32.totalorder %s174_s14, %s1272_s5  ;;  %p1278_p11 = scmp.lt.s32.totalorder %s1272_s5, %s1272_s5 }
  0xef   :  { %p1279_p12 = por %p1278_p11, %p1277_p10 }
  0xf1   :  { %p1280_p13 = pnand %p1279_p12, %p1273_p9 }
  0xf3   :  { %1283 = shalt.err (!%p1280_p13)
}
  0xf4   :  { %176 = dma.hbm_to_vmem [thread:$0]  %s1675_s13, 128, %s174_s14, [#allocation25]  }
  0xf5   :  { %1306 = dma.done.wait [#allocation4], 128  }
  0xf6   :  { %1307 = vsyncadd [#allocation4], 4294967168 }
  0xf7   :  { %1308 = dma.done.wait [#allocation7], 2064  }
  0xf8   :  { %1309 = vsyncadd [#allocation7], 4294965232 }
  0xf9   :  { %1310 = dma.done.wait [#allocation10], 32  }
  0xfa   :  { %1311 = vsyncadd [#allocation10], 4294967264 }
  0xfb   :  { %1312 = dma.done.wait [#allocation13], 2064  }
  0xfc   :  { %1313 = vsyncadd [#allocation13], 4294965232 }
  0xfd   :  { %1314 = dma.done.wait [#allocation16], 32  }
  0xfe   :  { %1315 = vsyncadd [#allocation16], 4294967264 }
  0xff   :  { %1316 = dma.done.wait [#allocation19], 2064  }
 0x100   :  { %1317 = vsyncadd [#allocation19], 4294965232 }
 0x101   :  { %1318 = dma.done.wait [#allocation22], 32  }
 0x102   :  { %1319 = vsyncadd [#allocation22], 4294967264 }
 0x103   :  { %1320 = dma.done.wait [#allocation25], 128  }
 0x104   :  { %1321 = vsyncadd [#allocation25], 4294967168  ;;  %v1340_v1 = vmov 0.0|0.0   ;;  %vm1341_vm0 = vmmov 0   ;;  %v1342_v2 = vmov 0.0   ;;  %v222_v3 = vld [vmem:[#allocation6] sm:$0xff]  ;;  %v322_v38 = vlaneseq }
 0x105   :  { %876 = vmatprep.subr.bf16.mxu0 %v1340_v1  ;;  %798 = vmatprep.mubr.msk.f32.mxu0 %vm1341_vm0, %v1342_v2  ;;  %v223_v4 = vld [vmem:[#allocation6 + $0x8] sm:$0xff]  ;;  %v224_v5 = vld [vmem:[#allocation6 + $0x10] sm:$0xff]  ;;  %v225_v7 = vld [vmem:[#allocation6 + $0x18] sm:$0xff]  ;;  %s1344_s13 = smov [#allocation26]   ;;  %vm678_vm3 = vcmask 57344  }
 0x106   :  { %900 = vmatprep.subr.bf16.mxu1 %v1340_v1  ;;  %833 = vmatprep.mubr.msk.f32.mxu1 %vm1341_vm0, %v1342_v2  ;;  %v877_v6 = vpack.c.bf16 %v223_v4, %v222_v3  ;;  %v880_v8 = vpack.c.bf16 %v225_v7, %v224_v5  ;;  %v226_v9 = vld [vmem:[#allocation6 + $0x20] sm:$0xff]  ;;  %v227_v10 = vld [vmem:[#allocation6 + $0x28] sm:$0xff]  ;;  %v228_v12 = vld [vmem:[#allocation6 + $0x30] sm:$0xff]  ;;  %v1624_v39 = vand.u32 127, %v322_v38  ;;  %s686_s17 = sshll.u32 %s1344_s13, 4  ;;  %s687_s17 = int_to_ptr.vmem [resolvable:$true] %s686_s17 }
 0x107   :  { %v883_v11 = vpack.c.bf16 %v227_v10, %v226_v9  ;;  %v229_v13 = vld [vmem:[#allocation6 + $0x38] sm:$0xff]  ;;  %v230_v15 = vld [vmem:[#allocation6 + $0x40] sm:$0xff]  ;;  %v231_v16 = vld [vmem:[#allocation6 + $0x48] sm:$0xff]  ;;  %s1284_s4 = scalar_lea.vmem %s687_s17, 16  ;;  %s1288_s8 = scalar_lea.vmem %s687_s17, 32 }
 0x108   :  { %878 = vmatpush3.bf16.msra.mxu0 %v877_v6  ;;  %v886_v14 = vpack.c.bf16 %v229_v13, %v228_v12  ;;  %v889_v17 = vpack.c.bf16 %v231_v16, %v230_v15  ;;  %v232_v18 = vld [vmem:[#allocation6 + $0x50] sm:$0xff]  ;;  %v233_v19 = vld [vmem:[#allocation6 + $0x58] sm:$0xff]  ;;  %v234_v21 = vld [vmem:[#allocation6 + $0x60] sm:$0xff]  ;;  %vm324_vm1 = vcmp.lt.s32.totalorder %v1624_v39, 32  ;;  %vm571_vm2 = vcmp.lt.s32.totalorder %v1624_v39, 16  ;;  %p1285_p0 = scmp.ne.s32.totalorder %s687_s17, %s1284_s4  ;;  %p1289_p1 = scmp.lt.s32.totalorder %s687_s17, %s687_s17 }
 0x109   :  { %879 = vmatprep.subr.bf16.mxu0 %v1340_v1  ;;  %v892_v20 = vpack.c.bf16 %v233_v19, %v232_v18  ;;  %v235_v22 = vld [vmem:[#allocation6 + $0x68] sm:$0xff]  ;;  %v236_v24 = vld [vmem:[#allocation6 + $0x70] sm:$0xff]  ;;  %v237_v25 = vld [vmem:[#allocation6 + $0x78] sm:$0xff]  ;;  %v1628_v43 = vsel %vm324_vm1, 1.0, %v1342_v2  ;;  %p1290_p2 = scmp.lt.s32.totalorder %s1288_s8, %s1284_s4 }
 0x10a   :  { %v895_v23 = vpack.c.bf16 %v235_v22, %v234_v21  ;;  %v898_v26 = vpack.c.bf16 %v237_v25, %v236_v24  ;;  %v221_v27 = vld [vmem:[#allocation3] sm:$0xff]  ;;  %v702_v28 = vld [vmem:[#allocation8] ss:$0 sm:$0xff]  ;;  %v349_v32 = vld [vmem:[#allocation12] sm:$0xff] }
 0x10b   :  { %v350_v33 = vld [vmem:[#allocation12 + $0x8] sm:$0xff]  ;;  %v351_v34 = vld [vmem:[#allocation12 + $0x10] sm:$0xff]  ;;  %v352_v36 = vld [vmem:[#allocation12 + $0x18] sm:$0xff]  ;;  %p1291_p3 = por %p1290_p2, %p1289_p1 }
 0x10c   :  { %881 = vmatpush3.bf16.msra.mxu0 %v880_v8  ;;  %v901_v35 = vpack.c.bf16 %v350_v33, %v349_v32  ;;  %v904_v37 = vpack.c.bf16 %v352_v36, %v351_v34  ;;  %v353_v46 = vld [vmem:[#allocation12 + $0x20] sm:$0xff]  ;;  %v354_v47 = vld [vmem:[#allocation12 + $0x28] sm:$0xff]  ;;  %v355_v49 = vld [vmem:[#allocation12 + $0x30] sm:$0xff] }
 0x10d   :  { %882 = vmatprep.subr.bf16.mxu0 %v1340_v1  ;;  %v907_v48 = vpack.c.bf16 %v354_v47, %v353_v46  ;;  %v356_v50 = vld [vmem:[#allocation12 + $0x38] sm:$0xff]  ;;  %v357_v52 = vld [vmem:[#allocation12 + $0x40] sm:$0xff]  ;;  %v358_v53 = vld [vmem:[#allocation12 + $0x48] sm:$0xff]  ;;  %p1292_p4 = pnand %p1291_p3, %p1285_p0 }
 0x10e   :  { %902 = vmatpush3.bf16.msra.mxu1 %v901_v35  ;;  %v910_v51 = vpack.c.bf16 %v356_v50, %v355_v49  ;;  %v913_v54 = vpack.c.bf16 %v358_v53, %v357_v52  ;;  %v359_v55 = vld [vmem:[#allocation12 + $0x50] sm:$0xff]  ;;  %v360_v56 = vld [vmem:[#allocation12 + $0x58] sm:$0xff]  ;;  %v361_v58 = vld [vmem:[#allocation12 + $0x60] sm:$0xff] }
 0x10f   :  { %903 = vmatprep.subr.bf16.mxu1 %v1340_v1  ;;  %v916_v57 = vpack.c.bf16 %v360_v56, %v359_v55  ;;  %v362_v59 = vld [vmem:[#allocation12 + $0x68] sm:$0xff]  ;;  %v363_v61 = vld [vmem:[#allocation12 + $0x70] sm:$0xff]  ;;  %v364_v62 = vld [vmem:[#allocation12 + $0x78] sm:$0xff] }
 0x110   :  { %884 = vmatpush3.bf16.msra.mxu0 %v883_v11  ;;  %v919_v60 = vpack.c.bf16 %v362_v59, %v361_v58  ;;  %v922_v63 = vpack.c.bf16 %v364_v62, %v363_v61  ;;  %v704_v6 = vld [vmem:[#allocation9] ss:$0 sm:$0xff]  ;;  %v705_v8 = vld [vmem:[#allocation11] ss:$0 sm:$0xff]  ;;  %v706_v12 = vld [vmem:[#allocation14] ss:$0 sm:$0xff] }
 0x111   :  { %885 = vmatprep.subr.bf16.mxu0 %v1340_v1  ;;  %v471_v16 = vld [vmem:[#allocation18] sm:$0xff]  ;;  %v473_v18 = vld [vmem:[#allocation18 + $0x10] sm:$0xff]  ;;  %v480_v34 = vld [vmem:[#allocation18 + $0x48] sm:$0xff] }
 0x112   :  { %905 = vmatpush3.bf16.msra.mxu1 %v904_v37  ;;  %v479_v33 = vld [vmem:[#allocation18 + $0x40] sm:$0xff]  ;;  %v481_v36 = vld [vmem:[#allocation18 + $0x50] sm:$0xff]  ;;  %v482_v37 = vld [vmem:[#allocation18 + $0x58] sm:$0xff] }
 0x113   :  { %906 = vmatprep.subr.bf16.mxu1 %v1340_v1  ;;  %v937_v35 = vpack.c.bf16 %v480_v34, %v479_v33  ;;  %v708_v53 = vld [vmem:[#allocation17] ss:$0 sm:$0xff] }
 0x114   :  { %887 = vmatpush3.bf16.msra.mxu0 %v886_v14 }
 0x115   :  { %888 = vmatprep.subr.bf16.mxu0 %v1340_v1 }
 0x116   :  { %908 = vmatpush3.bf16.msra.mxu1 %v907_v48 }
 0x117   :  { %909 = vmatprep.subr.bf16.mxu1 %v1340_v1 }
 0x118   :  { %890 = vmatpush3.bf16.msra.mxu0 %v889_v17  ;;  %v472_v17 = vld [vmem:[#allocation18 + $0x8] sm:$0xff] }
 0x119   :  { %891 = vmatprep.subr.bf16.mxu0 %v1340_v1  ;;  %v925_v19 = vpack.c.bf16 %v472_v17, %v471_v16 }
 0x11a   :  { %911 = vmatpush3.bf16.msra.mxu1 %v910_v51  ;;  %v707_v51 = vld [vmem:[#allocation15] ss:$0 sm:$0xff] }
 0x11b   :  { %912 = vmatprep.subr.bf16.mxu1 %v1340_v1 }
 0x11c   :  { %893 = vmatpush3.bf16.msra.mxu0 %v892_v20  ;;  %v474_v20 = vld [vmem:[#allocation18 + $0x18] sm:$0xff] }
 0x11d   :  { %894 = vmatprep.subr.bf16.mxu0 %v1340_v1  ;;  %v928_v21 = vpack.c.bf16 %v474_v20, %v473_v18 }
 0x11e   :  { %914 = vmatpush3.bf16.msra.mxu1 %v913_v54 }
 0x11f   :  { %915 = vmatprep.subr.bf16.mxu1 %v1340_v1 }
 0x120   :  { %896 = vmatpush3.bf16.msra.mxu0 %v895_v23 }
 0x121   :  { %897 = vmatprep.subr.bf16.mxu0 %v1340_v1 }
 0x122   :  { %917 = vmatpush3.bf16.msra.mxu1 %v916_v57  ;;  %v709_v57 = vld [vmem:[#allocation20] ss:$0 sm:$0xff] }
 0x123   :  { %918 = vmatprep.subr.bf16.mxu1 %v1340_v1 }
 0x124   :  { %899 = vmatpush3.bf16.msra.mxu0 %v898_v26 }
 0x125   :  { %924 = vmatprep.subr.bf16.mxu0 %v1340_v1 }
 0x126   :  { %920 = vmatpush3.bf16.msra.mxu1 %v919_v60 }
 0x127   :  { %799 = vmatmul.mubr.f32.vlgmr.msra.gmra.mrb[0].mxu0 %v221_v27  ;;  %921 = vmatprep.subr.bf16.mxu1 %v1340_v1  ;;  %v475_v27 = vld [vmem:[#allocation18 + $0x20] sm:$0xff] }
 0x128   :  { %868 = vmatprep.mubr.msk.f32.mxu0 %vm1341_vm0, %v1342_v2  ;;  %926 = vmatpush3.bf16.msra.mxu0 %v925_v19 }
 0x129   :  { %927 = vmatprep.subr.bf16.mxu0 %v1340_v1 }
 0x12a   :  { %923 = vmatpush3.bf16.msra.mxu1 %v922_v63  ;;  %v710_v63 = vsel %vm571_vm2, 1.0, %v1342_v2 }
 0x12b   :  { %871 = vmatprep.subr.mxu1 %v1342_v2 }
 0x12c   :  { %929 = vmatpush3.bf16.msra.mxu0 %v928_v21 }
 0x12d   :  { %930 = vmatprep.subr.bf16.mxu0 %v1340_v1 }
 0x1fa   :  { %v311_v29 = vpop.f32.mrb[0].mxu0 }
 0x1fb   :  { %v312_v30 = vadd.f32 %v702_v28, %v311_v29  ;;  %v800_v31 = vpop.f32.mrb[1].mxu0  ;;  %v476_v28 = vld [vmem:[#allocation18 + $0x28] sm:$0xff] }
 0x1fc   :  { %v931_v29 = vpack.c.bf16 %v476_v28, %v475_v27  ;;  %v478_v31 = vld [vmem:[#allocation18 + $0x38] sm:$0xff] }
 0x1fd   :  { %317 = vadd.xlane.f32.xlu0 %v312_v30 }
 0x1fe   :  { %932 = vmatpush3.bf16.msra.mxu0 %v931_v29 }
 0x1ff   :  { %933 = vmatprep.subr.bf16.mxu0 %v1340_v1 }
 0x28a   :  { %v318_v40 = vpop.xlane.xlu0 %317 }
 0x28b   :  { %v319_v41 = vmul.f32 0.03125, %v318_v40  ;;  %v940_v40 = vpack.c.bf16 %v482_v37, %v481_v36 }
 0x28d   :  { %v320_v42 = vsub.f32 %v312_v30, %v319_v41  ;;  %v477_v30 = vld [vmem:[#allocation18 + $0x30] sm:$0xff]  ;;  %v483_v41 = vld [vmem:[#allocation18 + $0x60] sm:$0xff] }
 0x28e   :  { %v934_v32 = vpack.c.bf16 %v478_v31, %v477_v30 }
 0x28f   :  { %v321_v44 = vmul.f32 %v320_v42, %v320_v42 }
 0x290   :  { %935 = vmatpush3.bf16.msra.mxu0 %v934_v32 }
 0x291   :  { %v327_v45 = vmul.f32 %v1628_v43, %v321_v44  ;;  %936 = vmatprep.subr.bf16.mxu0 %v1340_v1  ;;  %v485_v44 = vld [vmem:[#allocation18 + $0x70] sm:$0xff] }
 0x293   :  { %328 = vadd.xlane.f32.xlu0 %v327_v45  ;;  %v486_v45 = vld [vmem:[#allocation18 + $0x78] sm:$0xff] }
 0x294   :  { %938 = vmatpush3.bf16.msra.mxu0 %v937_v35  ;;  %v946_v46 = vpack.c.bf16 %v486_v45, %v485_v44 }
 0x295   :  { %939 = vmatprep.subr.bf16.mxu0 %v1340_v1 }
 0x298   :  { %941 = vmatpush3.bf16.msra.mxu0 %v940_v40 }
 0x299   :  { %942 = vmatprep.subr.bf16.mxu0 %v1340_v1 }
 0x320   :  { %v329_v0 = vpop.xlane.xlu0 %328 }
 0x321   :  { %v330_v3 = vmul.f32 0.03125, %v329_v0 }
 0x323   :  { %v331_v4 = vadd.f32 1e-05, %v330_v3 }
 0x325   :  { %970 = vrsqrt.f32 %v331_v4  ;;  %v667_v4 = vld [vmem:[#allocation2] sm:$0x1] }
 0x32f   :  { %v971_v5 = vpop.eup %970 }
 0x330   :  { %v333_v7 = vmul.f32 %v971_v5, %v320_v42  ;;  %v484_v42 = vld [vmem:[#allocation18 + $0x68] sm:$0xff]  ;;  %v1343_v5 = vmov 0  }
 0x331   :  { %969 = vset.pattern.permute.xlu0 %v1343_v5 }
 0x332   :  { %v340_v9 = vmul.f32 %v704_v6, %v333_v7 }
 0x334   :  { %v347_v10 = vadd.f32 %v705_v8, %v340_v9 }
 0x336   :  { %v348_v11 = vmax.f32 %v347_v10, 0.0  ;;  %v711_v10 = vld [vmem:[#allocation21] ss:$0 sm:$0xff] }
 0x338   :  { %834 = vmatmul.mubr.f32.vlgmr.msra.gmra.mrb[0].mxu1 %v348_v11 }
 0x339   :  { %873 = vmatprep.mubr.msk.f32.mxu1 %vm1341_vm0, %v1342_v2  ;;  %v596_v2 = vld [vmem:[#allocation24] sm:$0xff] }
 0x40b   :  { %v438_v13 = vpop.f32.mrb[0].mxu1 }
 0x40c   :  { %v439_v14 = vadd.f32 %v706_v12, %v438_v13  ;;  %v835_v15 = vpop.f32.mrb[1].mxu1  ;;  %v712_v12 = vld [vmem:[#allocation23] ss:$0 sm:$0xff] }
 0x40d   :  { %v674_v15 = vshrl.u32 %v322_v38, 7 }
 0x40e   :  { %444 = vadd.xlane.f32.xlu1 %v439_v14 }
 0x40f   :  { %v675_v16 = vsub.s32 0, %v674_v15 }
 0x49b   :  { %v445_v22 = vpop.xlane.xlu1 %444 }
 0x49c   :  { %v446_v23 = vmul.f32 0.03125, %v445_v22 }
 0x49e   :  { %v447_v24 = vsub.f32 %v439_v14, %v446_v23 }
 0x4a0   :  { %v448_v25 = vmul.f32 %v447_v24, %v447_v24 }
 0x4a2   :  { %v449_v26 = vmul.f32 %v1628_v43, %v448_v25  ;;  %v943_v43 = vpack.c.bf16 %v484_v42, %v483_v41 }
 0x4a4   :  { %450 = vadd.xlane.f32.xlu1 %v449_v26  ;;  %944 = vmatpush3.bf16.msra.mxu0 %v943_v43 }
 0x4a5   :  { %945 = vmatprep.subr.bf16.mxu0 %v1340_v1 }
 0x4a8   :  { %947 = vmatpush3.bf16.msra.mxu0 %v946_v46 }
 0x531   :  { %v451_v47 = vpop.xlane.xlu1 %450 }
 0x532   :  { %v452_v48 = vmul.f32 0.03125, %v451_v47 }
 0x534   :  { %v453_v49 = vadd.f32 1e-05, %v452_v48 }
 0x536   :  { %972 = vrsqrt.f32 %v453_v49 }
 0x540   :  { %v973_v50 = vpop.eup %972 }
 0x541   :  { %v455_v52 = vmul.f32 %v973_v50, %v447_v24 }
 0x543   :  { %v462_v54 = vmul.f32 %v707_v51, %v455_v52 }
 0x545   :  { %v469_v55 = vadd.f32 %v708_v53, %v462_v54 }
 0x547   :  { %v470_v56 = vmax.f32 %v469_v55, 0.0 }
 0x549   :  { %869 = vmatmul.mubr.f32.vlgmr.msra.gmra.mrb[2].mxu0 %v470_v56 }
 0x61c   :  { %v560_v58 = vpop.f32.mrb[2].mxu0 }
 0x61d   :  { %v561_v59 = vadd.f32 %v709_v57, %v560_v58  ;;  %v870_v60 = vpop.f32.mrb[3].mxu0 }
 0x61f   :  { %566 = vadd.xlane.f32.xlu0 %v561_v59 }
 0x635   :  { %670 = vperm.xlu0 %969, %v667_v4  }
 0x6ac   :  { %v567_v61 = vpop.xlane.xlu0 %566 }
 0x6ad   :  { %v568_v1 = vmul.f32 0.0625, %v567_v61 }
 0x6af   :  { %v569_v62 = vsub.f32 %v561_v59, %v568_v1 }
 0x6b1   :  { %v570_v0 = vmul.f32 %v569_v62, %v569_v62 }
 0x6b3   :  { %v574_v3 = vmul.f32 %v710_v63, %v570_v0 }
 0x6b4   :  { %v671_v17 = vpop.permute.xlu0 %670 }
 0x6b5   :  { %575 = vadd.xlane.f32.xlu1 %v574_v3  ;;  %v676_v18 = vrot.slane %v671_v17, %v675_v16 }
 0x742   :  { %v576_v6 = vpop.xlane.xlu1 %575 }
 0x743   :  { %v577_v7 = vmul.f32 0.0625, %v576_v6 }
 0x745   :  { %v578_v8 = vadd.f32 1e-05, %v577_v7 }
 0x747   :  { %974 = vrsqrt.f32 %v578_v8 }
 0x751   :  { %v975_v9 = vpop.eup %974 }
 0x752   :  { %v580_v11 = vmul.f32 %v975_v9, %v569_v62 }
 0x754   :  { %v587_v13 = vmul.f32 %v711_v10, %v580_v11 }
 0x756   :  { %v594_v39 = vadd.f32 %v712_v12, %v587_v13 }
 0x758   :  { %v595_v14 = vmax.f32 %v594_v39, 0.0 }
 0x75a   :  { %872 = vmatpush3.xpose.msra.mxu1 %v595_v14 }
 0x75d   :  { %874 = vmatmul.mubr.f32.vlgmr.msra.gmra.mrb[2].mxu1 %v596_v2 }
 0x830   :  { %v663_v19 = vpop.f32.mrb[2].mxu1 }
 0x831   :  { %v677_v20 = vadd.f32 %v676_v18, %v663_v19  ;;  %v875_v21 = vpop.f32.mrb[3].mxu1 }
 0x833   :  { %679 = vst.msk [vmem:[#allocation26] sm:$0x1] %vm678_vm3, %v677_v20 }
 0x834   :  { %1295 = shalt.err (!%p1292_p4)
}
 0x835   :  { %s1296_s18 = scalar_lea.hbm %s1677_s15, 16 }
 0x836   :  { %p1297_p5 = scmp.ne.s32.totalorder %s1677_s15, %s1296_s18  ;;  %p1300_p6 = scmp.lt.u32.totalorder %s1296_s18, %s1677_s15 }
 0x838   :  { %p1302_p7 = pnand %p1300_p6, %p1297_p5 }
 0x83a   :  { %1305 = shalt.err (!%p1302_p7)
}
 0x83b   :  { %689 = dma.vmem_to_hbm [thread:$0]  %s687_s17, 16, %s1677_s15, [#allocation5]  }
 0x83c   :  { %1322 = dma.done.wait [#allocation5], 16  }
 0x83d   :  { %1323 = vsyncadd [#allocation5], 4294967280 }
 0x83e   :  { %693 = vsyncpa [#allocation4], 1 }
 0x83f   :  { %694 = vsyncpa [#allocation7], 1 }
 0x840   :  { %695 = vsyncpa [#allocation10], 1 }
 0x841   :  { %696 = vsyncpa [#allocation13], 1 }
 0x842   :  { %697 = vsyncpa [#allocation16], 1 }
 0x843   :  { %698 = vsyncpa [#allocation19], 1 }
 0x844   :  { %699 = vsyncpa [#allocation22], 1 }
 0x845   :  { %700 = vsyncpa [#allocation25], 1 }
 0x846   :  { %701 = vsyncpa [#allocation5], 1 }

</bundles_post_ra>
